<compile_context>
chip_gen: v7x
topology: tpu7x:2x2x1
jax: 0.10.0
libtpu: 0.0.40
codegen_flags: <defaults>
</compile_context>

<pallas_src>
import jax
import jax.numpy as jnp
from jax import lax
from jax.experimental import pallas as pl
from jax.experimental.pallas import tpu as pltpu

EPS = 1e-12


def _embeddings_kernel(ids_ref,      # SMEM (B*S,) int32  (scalar prefetch)
                       word_hbm,     # HBM  (V, H) f32    (memory_space=pl.ANY)
                       pos_ref,      # VMEM (T, H) f32    (rows sq*T .. sq*T+T-1)
                       gamma_ref,    # VMEM (1, H) f32
                       beta_ref,     # VMEM (1, H) f32
                       out_ref,      # VMEM (T, H) f32
                       gbuf,         # VMEM (T, H) f32 scratch (gathered word rows)
                       sem):         # DMA semaphore, shape (1,)
    T = gbuf.shape[0]
    n_sq = pl.num_programs(1)
    step = pl.program_id(0) * n_sq + pl.program_id(1)   # linear token-tile index
    base = step * T                                     # first flat token of this tile

    # 1) Issue one row-gather DMA per token (HBM -> VMEM scratch).  Token ids are
    #    free scalar reads from SMEM; all copies share one DMA semaphore.
    def issue(i, carry):
        tok = ids_ref[base + i]
        pltpu.make_async_copy(word_hbm.at[pl.ds(tok, 1), :],
                              gbuf.at[pl.ds(i, 1), :],
                              sem.at[0]).start()
        return carry

    lax.fori_loop(0, T, issue, 0)

    # 2) Drain: T waits of identical per-row size fully drain the shared
    #    semaphore; gbuf is only read after all rows have landed.
    def drain(i, carry):
        pltpu.make_async_copy(word_hbm.at[pl.ds(0, 1), :],
                              gbuf.at[pl.ds(i, 1), :],
                              sem.at[0]).wait()
        return carry

    lax.fori_loop(0, T, drain, 0)

    # 3) word + position embeddings, LayerNorm over H (all f32, matches PyTorch:
    #    biased variance, eps inside the sqrt).
    emb = gbuf[...] + pos_ref[...]                       # (T, H)
    u = jnp.mean(emb, axis=-1, keepdims=True)
    d = emb - u
    var = jnp.mean(d * d, axis=-1, keepdims=True)
    x = d * lax.rsqrt(var + EPS)
    out_ref[...] = (gamma_ref[...] * x + beta_ref[...]).astype(out_ref.dtype)
    # TODO(synk): nn.Dropout is identity in eval mode; training parity would need
    # a pltpu.prng_* mask here.


def _pick_token_tile(seq_len):
    # Largest tile <= 256 tokens that evenly divides the sequence length.
    for t in (256, 128):
        if seq_len % t == 0:
            return t
    return seq_len


def embeddings_forward(input_ids, word_emb, pos_emb, gamma, beta,
                       *, out_dtype=jnp.float32):
    B, S = input_ids.shape
    V, H = word_emb.shape
    T = _pick_token_tile(S)
    n_sq = S // T
    n_tok = B * S

    ids_flat = input_ids.reshape(n_tok).astype(jnp.int32)
    pos_slice = pos_emb[:S]                 # static slice: position rows 0..S-1
    gamma2d = gamma.reshape(1, H)
    beta2d = beta.reshape(1, H)

    # Advisory cost: the kernel is memory bound (gather read + output write).
    flops = 8 * n_tok * H
    bytes_accessed = (n_tok * H * 4        # gathered word rows
                      + S * H * 4          # position rows
                      + 2 * H * 4          # gamma / beta
                      + n_tok * 4          # ids
                      + n_tok * H * 4)     # output writeback

    out_flat = pl.pallas_call(
        _embeddings_kernel,
        out_shape=jax.ShapeDtypeStruct((n_tok, H), out_dtype),
        grid_spec=pltpu.PrefetchScalarGridSpec(
            num_scalar_prefetch=1,                              # ids -> SMEM
            grid=(B, n_sq),
            in_specs=[
                pl.BlockSpec(memory_space=pl.ANY),              # word table stays in HBM
                pl.BlockSpec((T, H), lambda b, sq, ids: (sq, 0)),   # position rows
                pl.BlockSpec((1, H), lambda b, sq, ids: (0, 0)),    # gamma
                pl.BlockSpec((1, H), lambda b, sq, ids: (0, 0)),    # beta
            ],
            out_specs=pl.BlockSpec((T, H),
                                   lambda b, sq, ids: (b * n_sq + sq, 0)),
            scratch_shapes=[
                pltpu.VMEM((T, H), jnp.float32),                # gather buffer
                pltpu.SemaphoreType.DMA((1,)),                  # shared gather semaphore
            ],
        ),
        compiler_params=pltpu.CompilerParams(
            dimension_semantics=("parallel", "parallel"),
            vmem_limit_bytes=32 * 1024 * 1024,
        ),
        cost_estimate=pl.CostEstimate(
            flops=flops, transcendentals=n_tok, bytes_accessed=bytes_accessed),
    )(ids_flat, word_emb, pos_slice, gamma2d, beta2d)

    return out_flat.reshape(B, S, H)


if __name__ == "__main__":
    # Small, deterministic config.
    vocab_size = 16
    hidden_size = 32
    max_position_size = 16
    batch = 2
    seq = 8

    key = jax.random.PRNGKey(0)
    k_ids, k_word, k_pos = jax.random.split(key, 3)

    input_ids = jax.random.randint(k_ids, (batch, seq), 0, vocab_size, dtype=jnp.int32)
    # nn.Embedding default init ~ N(0, 1); LayerNorm gamma=1, beta=0.
    word_emb = jax.random.normal(k_word, (vocab_size, hidden_size), dtype=jnp.float32)
    pos_emb = jax.random.normal(k_pos, (max_position_size, hidden_size), dtype=jnp.float32)
    gamma = jnp.ones((hidden_size,), dtype=jnp.float32)
    beta = jnp.zeros((hidden_size,), dtype=jnp.float32)

    out = embeddings_forward(input_ids, word_emb, pos_emb, gamma, beta)
    out = jax.block_until_ready(out)

    # Pure-JAX reference check.
    words_ref = word_emb[input_ids]                          # (B, S, H)
    pos_ref = pos_emb[jnp.arange(seq)][None, :, :]           # (1, S, H)
    emb_ref = words_ref + pos_ref
    u = emb_ref.mean(-1, keepdims=True)
    s = ((emb_ref - u) ** 2).mean(-1, keepdims=True)
    ref = gamma * ((emb_ref - u) / jnp.sqrt(s + EPS)) + beta
    assert out.shape == (batch, seq, hidden_size)
    assert jnp.max(jnp.abs(out - ref)) < 1e-4

    print("KERNEL_OK")
</pallas_src>

<mosaic_0001>
module attributes {stable_mosaic.version = 11 : i64} {
  func.func @_embeddings_kernel(%arg0: i32, %arg1: i32, %arg2: memref<16xi32, #tpu.memory_space<smem>>, %arg3: memref<16x32xf32, #tpu.memory_space<any>>, %arg4: memref<8x32xf32, #tpu.memory_space<vmem>>, %arg5: memref<1x32xf32, #tpu.memory_space<vmem>>, %arg6: memref<1x32xf32, #tpu.memory_space<vmem>>, %arg7: memref<8x32xf32, #tpu.memory_space<vmem>>, %arg8: memref<8x32xf32, #tpu.memory_space<vmem>>, %arg9: memref<1x!tpu.dma_semaphore, #tpu.memory_space<semaphore_mem>>) attributes {dimension_semantics = [#tpu.dimension_semantics<parallel>, #tpu.dimension_semantics<parallel>], iteration_bounds = array<i64: 2, 1>, scalar_prefetch = 1 : i64, scratch_operands = 2 : i64, tpu.core_type = #tpu.core_type<tc>, window_params = [{}, {transform_indices = @transform_1, window_bounds = array<i64: 8, 32>}, {pipeline_mode = #tpu.pipeline_mode<synchronous>, transform_indices = @transform_2, window_bounds = array<i64: 1, 32>}, {pipeline_mode = #tpu.pipeline_mode<synchronous>, transform_indices = @transform_3, window_bounds = array<i64: 1, 32>}, {transform_indices = @transform_4, window_bounds = array<i64: 8, 32>}]} {
    %c1_i32 = arith.constant 1 : i32
    %0 = arith.muli %arg0, %c1_i32 : i32
    %1 = arith.addi %0, %arg1 : i32
    %c8_i32 = arith.constant 8 : i32
    %2 = arith.muli %1, %c8_i32 : i32
    %c0_i32 = arith.constant 0 : i32
    %c8_i32_0 = arith.constant 8 : i32
    %3 = arith.addi %c0_i32, %c8_i32_0 : i32
    %c1_i32_1 = arith.constant 1 : i32
    scf.for %arg10 = %c0_i32 to %3 step %c1_i32_1  : i32 {
      %31 = arith.addi %2, %arg10 : i32
      %32 = arith.index_cast %31 : i32 to index
      %33 = memref.load %arg2[%32] : memref<16xi32, #tpu.memory_space<smem>>
      %c0_i32_20 = arith.constant 0 : i32
      %c0_i32_21 = arith.constant 0 : i32
      %34 = tpu.memref_slice %arg3[%33, %c0_i32_21] : memref<16x32xf32, #tpu.memory_space<any>> -> memref<1x32xf32, #tpu.memory_space<any>>
      %c0_i32_22 = arith.constant 0 : i32
      %35 = tpu.memref_slice %arg8[%arg10, %c0_i32_22] : memref<8x32xf32, #tpu.memory_space<vmem>> -> memref<1x32xf32, #tpu.memory_space<vmem>>
      %36 = tpu.memref_slice %arg9[%c0_i32_20] : memref<1x!tpu.dma_semaphore, #tpu.memory_space<semaphore_mem>> -> memref<1x!tpu.dma_semaphore, #tpu.memory_space<semaphore_mem>>
      %37 = tpu.memref_squeeze %36 : memref<1x!tpu.dma_semaphore, #tpu.memory_space<semaphore_mem>> -> memref<!tpu.dma_semaphore, #tpu.memory_space<semaphore_mem>>
      tpu.enqueue_dma source(%34 : memref<1x32xf32, #tpu.memory_space<any>>) target(%35 : memref<1x32xf32, #tpu.memory_space<vmem>>) target_semaphore(%37 : memref<!tpu.dma_semaphore, #tpu.memory_space<semaphore_mem>>)
    }
    %c8_i32_2 = arith.constant 8 : i32
    %c0_i32_3 = arith.constant 0 : i32
    %c8_i32_4 = arith.constant 8 : i32
    %4 = arith.addi %c0_i32_3, %c8_i32_4 : i32
    %c1_i32_5 = arith.constant 1 : i32
    scf.for %arg10 = %c0_i32_3 to %4 step %c1_i32_5  : i32 {
      %c0_i32_20 = arith.constant 0 : i32
      %c0_i32_21 = arith.constant 0 : i32
      %c0_i32_22 = arith.constant 0 : i32
      %31 = tpu.memref_slice %arg3[%c0_i32_21, %c0_i32_22] : memref<16x32xf32, #tpu.memory_space<any>> -> memref<1x32xf32, #tpu.memory_space<any>>
      %c0_i32_23 = arith.constant 0 : i32
      %32 = tpu.memref_slice %arg8[%arg10, %c0_i32_23] : memref<8x32xf32, #tpu.memory_space<vmem>> -> memref<1x32xf32, #tpu.memory_space<vmem>>
      %33 = tpu.memref_slice %arg9[%c0_i32_20] : memref<1x!tpu.dma_semaphore, #tpu.memory_space<semaphore_mem>> -> memref<1x!tpu.dma_semaphore, #tpu.memory_space<semaphore_mem>>
      %34 = tpu.memref_squeeze %33 : memref<1x!tpu.dma_semaphore, #tpu.memory_space<semaphore_mem>> -> memref<!tpu.dma_semaphore, #tpu.memory_space<semaphore_mem>>
      tpu.wait_dma2 semaphore(%34 : memref<!tpu.dma_semaphore, #tpu.memory_space<semaphore_mem>>) src(%31 : memref<1x32xf32, #tpu.memory_space<any>>) dst(%32 : memref<1x32xf32, #tpu.memory_space<vmem>>)
    }
    %c8_i32_6 = arith.constant 8 : i32
    %c0 = arith.constant 0 : index
    %c0_7 = arith.constant 0 : index
    %5 = vector.load %arg8[%c0, %c0_7] : memref<8x32xf32, #tpu.memory_space<vmem>>, vector<8x32xf32>
    %c0_8 = arith.constant 0 : index
    %c0_9 = arith.constant 0 : index
    %6 = vector.load %arg4[%c0_8, %c0_9] : memref<8x32xf32, #tpu.memory_space<vmem>>, vector<8x32xf32>
    %7 = arith.addf %5, %6 : vector<8x32xf32>
    %cst = arith.constant dense<0.000000e+00> : vector<8xf32>
    %8 = vector.multi_reduction <add>, %7, %cst [1] : vector<8x32xf32> to vector<8xf32>
    %9 = vector.shape_cast %8 : vector<8xf32> to vector<8x1xf32>
    %cst_10 = arith.constant 3.200000e+01 : f32
    %10 = vector.broadcast %cst_10 : f32 to vector<8x1xf32>
    %11 = arith.divf %9, %10 : vector<8x1xf32>
    %12 = vector.broadcast %11 : vector<8x1xf32> to vector<8x32xf32>
    %13 = arith.subf %7, %12 : vector<8x32xf32>
    %14 = arith.mulf %13, %13 : vector<8x32xf32>
    %cst_11 = arith.constant dense<0.000000e+00> : vector<8xf32>
    %15 = vector.multi_reduction <add>, %14, %cst_11 [1] : vector<8x32xf32> to vector<8xf32>
    %16 = vector.shape_cast %15 : vector<8xf32> to vector<8x1xf32>
    %cst_12 = arith.constant 3.200000e+01 : f32
    %17 = vector.broadcast %cst_12 : f32 to vector<8x1xf32>
    %18 = arith.divf %16, %17 : vector<8x1xf32>
    %cst_13 = arith.constant 9.99999996E-13 : f32
    %19 = vector.broadcast %cst_13 : f32 to vector<8x1xf32>
    %20 = arith.addf %18, %19 : vector<8x1xf32>
    %21 = math.rsqrt %20 : vector<8x1xf32>
    %22 = vector.broadcast %21 : vector<8x1xf32> to vector<8x32xf32>
    %23 = arith.mulf %13, %22 : vector<8x32xf32>
    %c0_14 = arith.constant 0 : index
    %c0_15 = arith.constant 0 : index
    %24 = vector.load %arg5[%c0_14, %c0_15] : memref<1x32xf32, #tpu.memory_space<vmem>>, vector<1x32xf32>
    %25 = vector.broadcast %24 : vector<1x32xf32> to vector<8x32xf32>
    %26 = arith.mulf %25, %23 : vector<8x32xf32>
    %c0_16 = arith.constant 0 : index
    %c0_17 = arith.constant 0 : index
    %27 = vector.load %arg6[%c0_16, %c0_17] : memref<1x32xf32, #tpu.memory_space<vmem>>, vector<1x32xf32>
    %28 = vector.broadcast %27 : vector<1x32xf32> to vector<8x32xf32>
    %29 = arith.addf %26, %28 : vector<8x32xf32>
    %c0_18 = arith.constant 0 : index
    %c0_19 = arith.constant 0 : index
    %30 = vector.load %arg7[%c0_18, %c0_19] : memref<8x32xf32, #tpu.memory_space<vmem>>, vector<8x32xf32>
    tpu.vector_store %arg7[%c0_18, %c0_19], %29 {strides = array<i32>} : memref<8x32xf32, #tpu.memory_space<vmem>>, vector<8x32xf32>,
    return
  }
  func.func @transform_1(%arg0: i32, %arg1: i32, %arg2: memref<16xi32, #tpu.memory_space<smem>>) -> (i32, i32) {
    %c0_i32 = arith.constant 0 : i32
    %c0_i32_0 = arith.constant 0 : i32
    return %arg1, %c0_i32 : i32, i32
  }
  func.func @transform_2(%arg0: i32, %arg1: i32, %arg2: memref<16xi32, #tpu.memory_space<smem>>) -> (i32, i32) {
    %c0_i32 = arith.constant 0 : i32
    %c0_i32_0 = arith.constant 0 : i32
    %c0_i32_1 = arith.constant 0 : i32
    return %c0_i32, %c0_i32_0 : i32, i32
  }
  func.func @transform_3(%arg0: i32, %arg1: i32, %arg2: memref<16xi32, #tpu.memory_space<smem>>) -> (i32, i32) {
    %c0_i32 = arith.constant 0 : i32
    %c0_i32_0 = arith.constant 0 : i32
    %c0_i32_1 = arith.constant 0 : i32
    return %c0_i32, %c0_i32_0 : i32, i32
  }
  func.func @transform_4(%arg0: i32, %arg1: i32, %arg2: memref<16xi32, #tpu.memory_space<smem>>) -> (i32, i32) {
    %c1_i32 = arith.constant 1 : i32
    %0 = arith.muli %arg0, %c1_i32 : i32
    %1 = arith.addi %0, %arg1 : i32
    %c0_i32 = arith.constant 0 : i32
    %c0_i32_0 = arith.constant 0 : i32
    return %1, %c0_i32 : i32, i32
  }
}

</mosaic_0001>

<bundles_post_ra>
// kernel: tpu_custom_call.1
= control target key start
LH: loop header
LB: loop body
LE: loop exit
PB: predicated region body
PF: predicated region fallthrough
CT: control target
= control target key end

     0   :  { %s862_s0 = inlined_call_operand.hbm [shape: s32[16], index: 0, kind: input, shape index: {}]   ;;  %s863_s1 = inlined_call_operand.hbm [shape: f32[16,32], index: 1, kind: input, shape index: {}]   ;;  %s864_s2 = inlined_call_operand.hbm [shape: f32[8,32], index: 2, kind: input, shape index: {}]   ;;  %s865_s3 = inlined_call_operand.vmem [shape: f32[1,32], index: 3, kind: input, shape index: {}]   ;;  %s866_s4 = inlined_call_operand.vmem [shape: f32[1,32], index: 4, kind: input, shape index: {}]   ;;  %s867_s5 = inlined_call_operand.hbm [shape: f32[16,32], index: 5, kind: output, shape index: {}]  }
   0x1   :  { %873 = sst [smem:[#allocation18_spill]] %s864_s2  ;;  %s463_s20 = scalar_lea.hbm %s862_s0, 16 }
   0x2   :  { %p464_p0 = scmp.ne.s32.totalorder %s862_s0, %s463_s20  ;;  %p467_p1 = scmp.lt.u32.totalorder %s463_s20, %s862_s0 }
   0x4   :  { %p469_p2 = pnand %p467_p1, %p464_p0 }
   0x6   :  { %472 = shalt.err (!%p469_p2)  }
   0x7   :  { %s629_s25 = smov [#allocation5]  }
   0x8   :  { %11 = dma.hbm_to_smem %s862_s0, 16, %s629_s25, [#allocation4] }
   0x9   :  { %585 = dma.done.wait [#allocation4], 16 }
   0xa   :  { %586 = vsyncadd [#allocation4], 4294967280 }
   0xb   :  { %13 = sfence }
   0xc   :  { %14 = vsyncpa [#allocation7], 0 }
   0xd   :  { %15 = vsyncpa [#allocation8], 0 }
   0xe   :  { %17 = vsyncpa [#allocation8 + $0x1], 0  ;;  %s675_s28 = smov 0   ;;  %s677_s29 = smov 0  }
   0xf   :  { %s679_s30 = smov 0   ;;  %s681_s6 = smov 0  }
  0x10   :  { %s683_s7 = smov 0   ;;  %s685_s8 = smov 0  }
  0x11 LB: > { %s362_s0 = sadd.s32 4294967295, %s619_s8   ;;  %s363_s9 = sadd.s32 4294967294, %s619_s8   ;;  %s619_s8 = sphi %s685_s8, %s23_s8   ;;  %s615_s7 = sphi %s683_s7, %s891_s7   ;;  %s611_s6 = sphi %s681_s6, %s890_s6   ;;  %s607_s30 = sphi %s679_s30, %s889_s30   ;;  %s603_s29 = sphi %s677_s29, %s888_s29   ;;  %s599_s28 = sphi %s675_s28, %s887_s28  }
  0x12   : > { %s35_s10 = sadd.s32 1, %s615_s7  ;;  %s112_s11 = sadd.s32 1, %s607_s30 }
  0x13   : > { %p37_p3 = scmp.ge.s32.totalorder %s35_s10, 2  ;;  %p122_p4 = scmp.ne.s32.totalorder %s607_s30, %s603_s29 }
  0x14   : > { %p123_p5 = scmp.eq.s32.totalorder %s362_s0, 1  ;;  %p128_p6 = scmp.ne.s32.totalorder %s603_s29, %s599_s28 }
  0x15   : > { %s893_s10 = smov (%p37_p3, %s35_s10), 0  ;;  %p129_p8 = scmp.eq.s32.totalorder %s363_s9, 1 }
  0x16   : > { %p715_p7 = por %p123_p5, %p122_p4  ;;  %s109_s13 = ssub.s32 %s615_s7, %s893_s10 }
  0x17   : > { %p364_p9 = scmp.ge.s32.totalorder %s619_s8, 1  ;;  %p110_p10 = scmp.eq.s32.totalorder %s109_s13, 0 }
  0x18   : > { %s874_s12 = scalar_select %p715_p7, 1, 0 }
  0x19   : > { %p722_p11 = por %p129_p8, %p128_p6  ;;  %p136_p12 = scmp.lt.s32.totalorder %s619_s8, 3 }
  0x1a   : > { %s728_s15 = scalar_select %p110_p10, %s607_s30, %s112_s11  }
  0x1b   : > { %s875_s14 = scalar_select %p722_p11, 1, 0 }
  0x1c   : > { %p730_p13 = pnand %p364_p9, %p136_p12  ;;  %p734_p0 = scmp.eq.s32.totalorder %s362_s0, 0 }
  0x1d   : > { %s630_s18 = smov [#allocation6]   ;;  %s879_s2 = sld [smem:[#allocation18_spill]] }
  0x1e   : > { %s876_s16 = scalar_select %p730_p13, 1, 0 }
  0x1f   : > { %s877_s17 = scalar_select %p734_p0, 1, 0 }
  0x20   : > { %p384_p1 = pneg %p730_p13  ;;  %s151_s19 = sshll.u32 %s630_s18, 4  ;;  %s152_s19 = int_to_ptr.vmem [resolvable:$true] %s151_s19 }
  0x22   : > { %p742_p2 = pnand %p734_p0, %p384_p1 }
  0x23   : > { %s473_s23 = scalar_lea.hbm %s879_s2, 128 }
  0x24   : > { %p474_p3 = scmp.ne.s32.totalorder %s879_s2, %s473_s23  ;;  %p475_p4 = pneg %p742_p2 }
  0x25   : > { %p480_p8 = scmp.lt.u32.totalorder %s473_s23, %s879_s2 }
  0x26   : > { %p476_p5 = pnand %p475_p4, %p474_p3 }
  0x28   : > { %p477_p6 = pneg %p476_p5 }
  0x2a   : > { %p482_p9 = pnand %p480_p8, %p477_p6 }
  0x2c   : > { %485 = shalt.err (!%p482_p9)
}
  0x2d   : > { %s486_s0 = scalar_lea.vmem %s152_s19, 128  ;;  %p494_p11 = scmp.lt.s32.totalorder %s152_s19, %s152_s19 }
  0x2e   : > { %p487_p10 = scmp.ne.s32.totalorder %s152_s19, %s486_s0  ;;  %p495_p7 = scmp.lt.s32.totalorder %s486_s0, %s486_s0 }
  0x30   : > { %p489_p12 = pnand %p487_p10, %p475_p4  ;;  %p496_p0 = por %p495_p7, %p494_p11 }
  0x32   : > { %p490_p1 = pneg %p489_p12 }
  0x34   : > { %p497_p13 = pnand %p496_p0, %p490_p1 }
  0x36   : > { %500 = shalt.err (!%p497_p13)
}
  0x37   : > { %387 = dma.hbm_to_vmem [thread:$0]  (!%p742_p2), %s879_s2, 128, %s152_s19, [#allocation7]  }
  0x38   : > { %p880_p3 = scmp.ne.s32.totalorder %s876_s16, 0 }
  0x39   : > { %p881_p5 = scmp.ne.s32.totalorder (!%p880_p3), %s877_s17, 0 }
  0x3a   : > { %170 = sbr.rel (%p880_p3) target bundleno = 441 (0x1b9), region = 32 }
  0x41   : > { %588 = dma.done.wait (%p881_p5), [#allocation7], 128  }
  0x42   : > { %590 = vsyncadd (%p881_p5), [#allocation7], 4294967168  ;;  %s872_s13 = sand.u32 1, %s603_s29   ;;  %s369_s18 = sshll.u32 %s611_s6, 3 }
  0x43   : > { %s772_s20 = sshll.u32 %s872_s13, 3  ;;  %s775_s19 = smov 0  }
  0x44 LB: >> { %s198_s16 = sadd.s32 %s623_s19, %s369_s18  ;;  %s202_s22 = scalar_lea.vmem [#allocation2], %s623_s19  ;;  %s623_s19 = sphi %s775_s19, %s197_s19  }
  0x45   : >> { %s199_s17 = sld [smem:[#allocation5 + %s198_s16]]  ;;  %s210_s23 = sshll.u32 %s202_s22, 4  ;;  %s211_s23 = int_to_ptr.vmem [resolvable:$true] %s210_s23 }
  0x46   : >> { %s503_s13 = scalar_lea.hbm %s863_s1, 256 }
  0x4b   : >> { %s370_s24 = sshll.u32 %s199_s17, 4 }
  0x4c   : >> { %s201_s27 = scalar_lea.hbm %s863_s1, %s370_s24 }
  0x4d   : >> { %s501_s0 = scalar_lea.hbm %s201_s27, 16  ;;  %p504_p11 = scmp.lt.u32.totalorder %s201_s27, %s863_s1 }
  0x4e   : >> { %p502_p7 = scmp.ne.s32.totalorder %s201_s27, %s501_s0  ;;  %p505_p13 = scmp.lt.u32.totalorder %s503_s13, %s501_s0 }
  0x4f   : >> { %p507_p2 = scmp.lt.u32.totalorder %s501_s0, %s201_s27 }
  0x50   : >> { %p506_p0 = por %p505_p13, %p504_p11 }
  0x52   : >> { %p508_p4 = por %p507_p2, %p506_p0 }
  0x54   : >> { %p509_p6 = pnand %p508_p4, %p502_p7 }
  0x56   : >> { %512 = shalt.err (!%p509_p6)  }
  0x57   : >> { %s513_s16 = scalar_lea.vmem %s211_s23, 16  ;;  %s631_s17 = smov [#allocation2]  }
  0x58   : >> { %p514_p8 = scmp.ne.s32.totalorder %s211_s23, %s513_s16  ;;  %s515_s22 = sshll.u32 %s631_s17, 4  ;;  %s516_s22 = int_to_ptr.vmem [resolvable:$false] %s515_s22 }
  0x59   : >> { %s517_s24 = scalar_lea.vmem %s516_s22, 128  ;;  %p518_p9 = scmp.lt.s32.totalorder %s211_s23, %s516_s22 }
  0x5a   : >> { %p519_p10 = scmp.lt.s32.totalorder %s517_s24, %s513_s16 }
  0x5c   : >> { %p520_p12 = por %p519_p10, %p518_p9 }
  0x5e   : >> { %p521_p1 = pnand %p520_p12, %p514_p8 }
  0x60   : >> { %524 = shalt.err (!%p521_p1)  }
  0x61   : >> { %213 = dma.hbm_to_vmem [thread:$0]  %s201_s27, 16, %s211_s23, [#allocation3] }
  0x62   : >> { %s197_s19 = sadd.s32 1, %s623_s19  }
  0x63   : >> { %p194_p3 = scmp.ge.s32.totalorder %s197_s19, 8  }
  0x64   : > { %s625_s2 = smov (%p194_p3), 0  }
  0x65   : > { %196 = sbr.rel (!%p194_p3) target bundleno = 68 (0x44), region = 90 }
  0x6c LB: >> { %591 = dma.done.wait [#allocation3], 16  ;;  %s627_s2 = sphi %s625_s2, %s219_s2  }
  0x6d   : >> { %592 = vsyncadd [#allocation3], 4294967280  ;;  %s219_s2 = sadd.s32 1, %s627_s2  }
  0x6e   : >> { %p216_p5 = scmp.ge.s32.totalorder %s219_s2, 8  }
  0x6f   : > { %v223_v0 = vld [vmem:[#allocation2] sm:$0xff] (%p216_p5)  ;;  %v224_v1 = vld [vmem:[#allocation6] sm:$0xff] (%p216_p5)  ;;  %vm226_vm0 = vcmask (%p216_p5), 261120   ;;  %s374_s23 = sshll.u32 (%p216_p5), %s611_s6, 7  ;;  %s882_s25 = scalar_lea.vmem (%p216_p5), [#allocation9], %s772_s20 }
  0x70   : > { %218 = sbr.rel (!%p216_p5) target bundleno = 108 (0x6c), region = 101  ;;  %v225_v2 = vadd.f32 (%p216_p5), %v224_v1, %v223_v0  ;;  %v371_v13 = vld [vmem:[%s865_s3] ss:$0 sm:$0xff] (%p216_p5)  ;;  %s273_s26 = sshll.u32 (%p216_p5), %s882_s25, 4  ;;  %s812_s26 = int_to_ptr.vmem [resolvable:$true] %s273_s26 }
  0x71   : > { %v372_v15 = vld [vmem:[%s866_s4] ss:$0 sm:$0xff] (%p216_p5)  ;;  %s810_s9 = scalar_lea.hbm (%p216_p5), %s867_s5, %s374_s23  ;;  %s883_s11 = smov (%p216_p5), %s882_s25 }
  0x72   : > { %v227_v3 = vsel (%p216_p5), %vm226_vm0, %v225_v2, 0.0  ;;  %s884_s16 = sand.u32 (%p216_p5), 1, %s603_s29   ;;  %s525_s6 = scalar_lea.vmem (%p216_p5), %s812_s26, 128 }
  0x73   : > { %228 = vadd.xlane.f32.xlu0 (%p216_p5), %v227_v3  ;;  %s259_s17 = scalar_lea.sflag (%p216_p5), [#allocation8], %s884_s16  ;;  %p526_p7 = scmp.ne.s32.totalorder (%p216_p5), %s812_s26, %s525_s6 }
  0x74   : > { %p885_p11 = scmp.ne.s32.totalorder (%p216_p5), %s874_s12, 0  ;;  %s632_s22 = smov (%p216_p5), [#allocation9]  }
  0x75   : > { %s529_s24 = sshll.u32 (%p216_p5), %s632_s22, 4  ;;  %s530_s24 = int_to_ptr.vmem [resolvable:$false] %s529_s24 }
  0x76   : > { %p527_p13 = pnand (%p216_p5), %p526_p7, %p885_p11  ;;  %s531_s2 = scalar_lea.vmem (%p216_p5), %s530_s24, 256 }
  0x77   : > { %p532_p2 = scmp.lt.s32.totalorder %s812_s26, %s530_s24  ;;  %p533_p4 = scmp.lt.s32.totalorder %s531_s2, %s525_s6 }
  0x78   : > { %p528_p0 = pneg %p527_p13 }
  0x79   : > { %p534_p6 = por %p533_p4, %p532_p2 }
  0x7b   : > { %p535_p8 = pnand %p534_p6, %p528_p0 }
 0x100   : > { %v229_v4 = vpop.xlane.xlu0 %228 }
 0x101   : > { %v231_v5 = vmul.f32 0.03125, %v229_v4 }
 0x103   : > { %v232_v6 = vsub.f32 %v225_v2, %v231_v5 }
 0x105   : > { %v233_v7 = vmul.f32 %v232_v6, %v232_v6 }
 0x107   : > { %v234_v8 = vsel %vm226_vm0, %v233_v7, 0.0 }
 0x108   : > { %235 = vadd.xlane.f32.xlu0 %v234_v8 }
 0x195   : > { %v236_v9 = vpop.xlane.xlu0 %235 }
 0x196   : > { %v237_v10 = vmul.f32 0.03125, %v236_v9 }
 0x198   : > { %v238_v11 = vadd.f32 1e-12, %v237_v10 }
 0x19a   : > { %461 = vrsqrt.f32 %v238_v11 }
 0x1a4   : > { %v462_v12 = vpop.eup %461 }
 0x1a5   : > { %v240_v14 = vmul.f32 %v462_v12, %v232_v6 }
 0x1a7   : > { %v248_v16 = vmul.f32 %v371_v13, %v240_v14 }
 0x1a9   : > { %v256_v17 = vadd.f32 %v372_v15, %v248_v16 }
 0x1ab   : > { %257 = vst.msk [vmem:[%s883_s11] sm:$0xff] %vm226_vm0, %v256_v17 }
 0x1ac   : > { %538 = shalt.err (!%p535_p8)
}
 0x1ad   : > { %s539_s20 = scalar_lea.hbm %s810_s9, 128  ;;  %s543_s21 = scalar_lea.hbm %s867_s5, 256 }
 0x1ae   : > { %p540_p9 = scmp.ne.s32.totalorder %s810_s9, %s539_s20  ;;  %p544_p1 = scmp.lt.u32.totalorder %s810_s9, %s867_s5 }
 0x1af   : > { %p545_p3 = scmp.lt.u32.totalorder %s543_s21, %s539_s20  ;;  %p547_p7 = scmp.lt.u32.totalorder %s539_s20, %s810_s9 }
 0x1b0   : > { %p541_p10 = pnand %p540_p9, %p885_p11 }
 0x1b1   : > { %p546_p5 = por %p545_p3, %p544_p1 }
 0x1b2   : > { %p542_p12 = pneg %p541_p10 }
 0x1b3   : > { %p548_p13 = por %p547_p7, %p546_p5 }
 0x1b5   : > { %p549_p0 = pnand %p548_p13, %p542_p12 }
 0x1b7   : > { %552 = shalt.err (!%p549_p0)
}
 0x1b8   : > { %382 = dma.vmem_to_hbm [thread:$0]  (%p885_p11), %s812_s26, 128, %s810_s9, %s259_s17  }
 0x1b9 PF: > { %p394_p2 = scmp.ge.s32.totalorder %s619_s8, 2  ;;  %s285_s25 = sand.u32 1, %s599_s28  }
 0x1ba   : > { %p886_p4 = scmp.ne.s32.totalorder %s875_s14, 0  ;;  %s286_s27 = scalar_lea.sflag [#allocation8], %s285_s25 }
 0x1bc   : > { %p389_p6 = pnand %p394_p2, %p886_p4 }
 0x1be   : > { %594 = dma.done.wait (!%p389_p6), %s286_s27, 128  }
 0x1bf   : > { %596 = vsyncadd (!%p389_p6), %s286_s27, 4294967168  ;;  %s23_s8 = sadd.s32 1, %s619_s8   ;;  %s887_s28 = smov %s603_s29 }
 0x1c0   : > { %p20_p8 = scmp.ge.s32.totalorder %s23_s8, 4   ;;  %s888_s29 = smov %s607_s30 }
 0x1c1   : > { %s889_s30 = smov %s728_s15  ;;  %s890_s6 = smov %s615_s7 }
 0x1c2   : > { %s891_s7 = smov %s893_s10  ;;  %22 = sbr.rel (!%p20_p8) target bundleno = 17 (0x11), region = 112 }
 0x1c9   :  { %291 = vsyncpa [#allocation7], 1 }
 0x1ca   :  { %293 = vsyncpa [#allocation7 + $0x1], 1 }
 0x1cb   :  { %294 = vsyncpa [#allocation8], 1 }
 0x1cc   :  { %296 = vsyncpa [#allocation8 + $0x1], 1 }
 0x1cd   :  { %297 = vsyncmov [#allocation3] }
 0x1d0   :  { %s298_s12 = vpop.sfrf %297 }
 0x1d1   :  { %p377_p11 = scmp.ne.s32.totalorder %s298_s12, 0 }
 0x1d3   :  { %302 = shalt.err (%p377_p11)  }

</bundles_post_ra>
